<compile_context>
chip_gen: v7x
topology: tpu7x:2x2x1
jax: 0.10.0
libtpu: 0.0.40
codegen_flags: <defaults>
</compile_context>

<pallas_src>
import jax
import jax.numpy as jnp
from jax import lax
from jax.experimental import pallas as pl
from jax.experimental.pallas import tpu as pltpu


def _nas_rnn_kernel(x_ref, wih_ref, whh_ref, bias_ref, out_ref):
    """Fused tanh-RNN forward over the whole sequence.

    x_ref:    (L, B, C)  input, already in time-major layout
    wih_ref:  (C, H)     W_ih^T
    whh_ref:  (H, H)     W_hh^T
    bias_ref: (1, H)     b_ih + b_hh
    out_ref:  (L, B, H)  all hidden states (the RNN output sequence)
    """
    L, B, _ = x_ref.shape
    H = whh_ref.shape[0]

    # Load weights / bias into vregs once; reused across all time steps.
    wih = wih_ref[...]                                    # (C, H)
    whh = whh_ref[...]                                    # (H, H)
    bias = jnp.broadcast_to(bias_ref[...], (B, H))        # hoisted broadcast

    def step(t, h):
        x_t = x_ref[t]                                    # (B, C) VMEM load
        pre = (
            jnp.dot(x_t, wih, preferred_element_type=jnp.float32)
            + bias
            + jnp.dot(h, whh, preferred_element_type=jnp.float32)
        )
        h_new = jnp.tanh(pre)
        out_ref[t] = h_new.astype(out_ref.dtype)          # VMEM store per step
        return h_new

    # unroll=True: L is static; gives the scheduler cross-step visibility
    # while preserving the sequential hidden-state dependency chain.
    lax.fori_loop(0, L, step, jnp.zeros((B, H), jnp.float32), unroll=True)


@jax.jit
def nas_rnn_forward(x_ncl, w_ih, w_hh, b_ih, b_hh):
    """x_ncl: (B, C, L) float32.  Returns y: (B, H, L) float32."""
    B, C, L = x_ncl.shape
    H = w_ih.shape[0]

    # Time-major input for cheap per-step leading-dim indexing in the kernel.
    x_lbc = jnp.transpose(x_ncl, (2, 0, 1)).astype(jnp.float32)   # (L, B, C)
    wih_t = jnp.transpose(w_ih).astype(jnp.float32)               # (C, H)
    whh_t = jnp.transpose(w_hh).astype(jnp.float32)               # (H, H)
    bias = (b_ih + b_hh).astype(jnp.float32).reshape(1, H)        # (1, H)

    out_lbh = pl.pallas_call(
        _nas_rnn_kernel,
        out_shape=jax.ShapeDtypeStruct((L, B, H), jnp.float32),
        grid=(1,),  # single invocation; the recurrence loop lives inside
        in_specs=[
            pl.BlockSpec((L, B, C), lambda i: (0, 0, 0)),
            pl.BlockSpec((C, H), lambda i: (0, 0)),
            pl.BlockSpec((H, H), lambda i: (0, 0)),
            pl.BlockSpec((1, H), lambda i: (0, 0)),
        ],
        out_specs=pl.BlockSpec((L, B, H), lambda i: (0, 0, 0)),
        compiler_params=pltpu.CompilerParams(
            dimension_semantics=("arbitrary",),
        ),
    )(x_lbc, wih_t, whh_t, bias)

    # Back to the PyTorch layout: (L, B, H) -> (B, H, L)  (one tiny XLA transpose)
    return jnp.transpose(out_lbh, (1, 2, 0))


def _reference_forward(x_ncl, w_ih, w_hh, b_ih, b_hh):
    """Pure-JAX reference (mirrors nn.RNN with tanh, h0 = 0)."""
    x_blc = jnp.transpose(x_ncl, (0, 2, 1))  # (B, L, C)
    B, L, C = x_blc.shape
    H = w_ih.shape[0]

    def step(h, x_t):
        h_new = jnp.tanh(x_t @ w_ih.T + b_ih + h @ w_hh.T + b_hh)
        return h_new, h_new

    h0 = jnp.zeros((B, H), jnp.float32)
    _, outs = jax.lax.scan(step, h0, jnp.transpose(x_blc, (1, 0, 2)))  # (L, B, H)
    return jnp.transpose(outs, (1, 2, 0))  # (B, H, L)


if __name__ == "__main__":
    # Small shapes consistent with the module: (batch, in_channels, seq_len)
    B, C, L, H = 2, 4, 8, 32

    key = jax.random.PRNGKey(0)
    kx, k1, k2, k3, k4 = jax.random.split(key, 5)

    x = jax.random.normal(kx, (B, C, L), dtype=jnp.float32)

    # nn.RNN default init: U(-1/sqrt(H), 1/sqrt(H)) for all params.
    bound = 1.0 / jnp.sqrt(jnp.float32(H))
    w_ih = jax.random.uniform(k1, (H, C), jnp.float32, -bound, bound)
    w_hh = jax.random.uniform(k2, (H, H), jnp.float32, -bound, bound)
    b_ih = jax.random.uniform(k3, (H,), jnp.float32, -bound, bound)
    b_hh = jax.random.uniform(k4, (H,), jnp.float32, -bound, bound)

    y = nas_rnn_forward(x, w_ih, w_hh, b_ih, b_hh)
    y = jax.block_until_ready(y)

    y_ref = _reference_forward(x, w_ih, w_hh, b_ih, b_hh)
    assert y.shape == (B, H, L)
    assert jnp.allclose(y, y_ref, rtol=1e-5, atol=1e-5)

    print("KERNEL_OK")
</pallas_src>

<mosaic_0001>
module attributes {stable_mosaic.version = 11 : i64} {
  func.func @_nas_rnn_kernel(%arg0: i32, %arg1: memref<8x2x4xf32, #tpu.memory_space<vmem>>, %arg2: memref<4x32xf32, #tpu.memory_space<vmem>>, %arg3: memref<32x32xf32, #tpu.memory_space<vmem>>, %arg4: memref<1x32xf32, #tpu.memory_space<vmem>>, %arg5: memref<8x2x32xf32, #tpu.memory_space<vmem>>) attributes {dimension_semantics = [#tpu.dimension_semantics<arbitrary>], iteration_bounds = array<i64: 1>, scalar_prefetch = 0 : i64, scratch_operands = 0 : i64, tpu.core_type = #tpu.core_type<tc>, window_params = [{pipeline_mode = #tpu.pipeline_mode<synchronous>, transform_indices = @transform_0, window_bounds = array<i64: 8, 2, 4>}, {pipeline_mode = #tpu.pipeline_mode<synchronous>, transform_indices = @transform_1, window_bounds = array<i64: 4, 32>}, {pipeline_mode = #tpu.pipeline_mode<synchronous>, transform_indices = @transform_2, window_bounds = array<i64: 32, 32>}, {pipeline_mode = #tpu.pipeline_mode<synchronous>, transform_indices = @transform_3, window_bounds = array<i64: 1, 32>}, {pipeline_mode = #tpu.pipeline_mode<synchronous>, transform_indices = @transform_4, window_bounds = array<i64: 8, 2, 32>}]} {
    %c0 = arith.constant 0 : index
    %c0_0 = arith.constant 0 : index
    %0 = vector.load %arg2[%c0, %c0_0] : memref<4x32xf32, #tpu.memory_space<vmem>>, vector<4x32xf32>
    %c0_1 = arith.constant 0 : index
    %c0_2 = arith.constant 0 : index
    %1 = vector.load %arg3[%c0_1, %c0_2] : memref<32x32xf32, #tpu.memory_space<vmem>>, vector<32x32xf32>
    %c0_3 = arith.constant 0 : index
    %c0_4 = arith.constant 0 : index
    %2 = vector.load %arg4[%c0_3, %c0_4] : memref<1x32xf32, #tpu.memory_space<vmem>>, vector<1x32xf32>
    %3 = vector.shape_cast %2 : vector<1x32xf32> to vector<1x32xf32>
    %4 = vector.broadcast %3 : vector<1x32xf32> to vector<2x32xf32>
    %cst = arith.constant 0.000000e+00 : f32
    %5 = vector.broadcast %cst : f32 to vector<2x32xf32>
    %c0_i32 = arith.constant 0 : i32
    %6 = arith.index_cast %c0_i32 : i32 to index
    %c0_5 = arith.constant 0 : index
    %c0_6 = arith.constant 0 : index
    %7 = vector.load %arg1[%6, %c0_5, %c0_6] : memref<8x2x4xf32, #tpu.memory_space<vmem>>, vector<1x2x4xf32>
    %8 = vector.shape_cast %7 : vector<1x2x4xf32> to vector<2x4xf32>
    %cst_7 = arith.constant dense<0.000000e+00> : vector<2x32xf32>
    %9 = tpu.matmul %8, %0, %cst_7 {dimension_numbers = #tpu.dot_dimension_numbers<[1], [0], [0], [1], [0, 0, 1, 1], [], []>} : vector<2x4xf32>, vector<4x32xf32>, vector<2x32xf32> -> vector<2x32xf32>
    %10 = arith.addf %9, %4 : vector<2x32xf32>
    %cst_8 = arith.constant dense<0.000000e+00> : vector<2x32xf32>
    %11 = tpu.matmul %5, %1, %cst_8 {dimension_numbers = #tpu.dot_dimension_numbers<[1], [0], [0], [1], [0, 0, 1, 1], [], []>} : vector<2x32xf32>, vector<32x32xf32>, vector<2x32xf32> -> vector<2x32xf32>
    %12 = arith.addf %10, %11 : vector<2x32xf32>
    %13 = math.tanh %12 : vector<2x32xf32>
    %14 = arith.index_cast %c0_i32 : i32 to index
    %c0_9 = arith.constant 0 : index
    %c0_10 = arith.constant 0 : index
    %15 = vector.load %arg5[%14, %c0_9, %c0_10] : memref<8x2x32xf32, #tpu.memory_space<vmem>>, vector<1x2x32xf32>
    %16 = vector.shape_cast %15 : vector<1x2x32xf32> to vector<2x32xf32>
    %17 = vector.shape_cast %13 : vector<2x32xf32> to vector<1x2x32xf32>
    tpu.vector_store %arg5[%14, %c0_9, %c0_10], %17 {strides = array<i32>} : memref<8x2x32xf32, #tpu.memory_space<vmem>>, vector<1x2x32xf32>,
    %c1_i32 = arith.constant 1 : i32
    %18 = arith.index_cast %c1_i32 : i32 to index
    %c0_11 = arith.constant 0 : index
    %c0_12 = arith.constant 0 : index
    %19 = vector.load %arg1[%18, %c0_11, %c0_12] : memref<8x2x4xf32, #tpu.memory_space<vmem>>, vector<1x2x4xf32>
    %20 = vector.shape_cast %19 : vector<1x2x4xf32> to vector<2x4xf32>
    %cst_13 = arith.constant dense<0.000000e+00> : vector<2x32xf32>
    %21 = tpu.matmul %20, %0, %cst_13 {dimension_numbers = #tpu.dot_dimension_numbers<[1], [0], [0], [1], [0, 0, 1, 1], [], []>} : vector<2x4xf32>, vector<4x32xf32>, vector<2x32xf32> -> vector<2x32xf32>
    %22 = arith.addf %21, %4 : vector<2x32xf32>
    %cst_14 = arith.constant dense<0.000000e+00> : vector<2x32xf32>
    %23 = tpu.matmul %13, %1, %cst_14 {dimension_numbers = #tpu.dot_dimension_numbers<[1], [0], [0], [1], [0, 0, 1, 1], [], []>} : vector<2x32xf32>, vector<32x32xf32>, vector<2x32xf32> -> vector<2x32xf32>
    %24 = arith.addf %22, %23 : vector<2x32xf32>
    %25 = math.tanh %24 : vector<2x32xf32>
    %26 = arith.index_cast %c1_i32 : i32 to index
    %c0_15 = arith.constant 0 : index
    %c0_16 = arith.constant 0 : index
    %27 = vector.load %arg5[%26, %c0_15, %c0_16] : memref<8x2x32xf32, #tpu.memory_space<vmem>>, vector<1x2x32xf32>
    %28 = vector.shape_cast %27 : vector<1x2x32xf32> to vector<2x32xf32>
    %29 = vector.shape_cast %25 : vector<2x32xf32> to vector<1x2x32xf32>
    tpu.vector_store %arg5[%26, %c0_15, %c0_16], %29 {strides = array<i32>} : memref<8x2x32xf32, #tpu.memory_space<vmem>>, vector<1x2x32xf32>,
    %c2_i32 = arith.constant 2 : i32
    %30 = arith.index_cast %c2_i32 : i32 to index
    %c0_17 = arith.constant 0 : index
    %c0_18 = arith.constant 0 : index
    %31 = vector.load %arg1[%30, %c0_17, %c0_18] : memref<8x2x4xf32, #tpu.memory_space<vmem>>, vector<1x2x4xf32>
    %32 = vector.shape_cast %31 : vector<1x2x4xf32> to vector<2x4xf32>
    %cst_19 = arith.constant dense<0.000000e+00> : vector<2x32xf32>
    %33 = tpu.matmul %32, %0, %cst_19 {dimension_numbers = #tpu.dot_dimension_numbers<[1], [0], [0], [1], [0, 0, 1, 1], [], []>} : vector<2x4xf32>, vector<4x32xf32>, vector<2x32xf32> -> vector<2x32xf32>
    %34 = arith.addf %33, %4 : vector<2x32xf32>
    %cst_20 = arith.constant dense<0.000000e+00> : vector<2x32xf32>
    %35 = tpu.matmul %25, %1, %cst_20 {dimension_numbers = #tpu.dot_dimension_numbers<[1], [0], [0], [1], [0, 0, 1, 1], [], []>} : vector<2x32xf32>, vector<32x32xf32>, vector<2x32xf32> -> vector<2x32xf32>
    %36 = arith.addf %34, %35 : vector<2x32xf32>
    %37 = math.tanh %36 : vector<2x32xf32>
    %38 = arith.index_cast %c2_i32 : i32 to index
    %c0_21 = arith.constant 0 : index
    %c0_22 = arith.constant 0 : index
    %39 = vector.load %arg5[%38, %c0_21, %c0_22] : memref<8x2x32xf32, #tpu.memory_space<vmem>>, vector<1x2x32xf32>
    %40 = vector.shape_cast %39 : vector<1x2x32xf32> to vector<2x32xf32>
    %41 = vector.shape_cast %37 : vector<2x32xf32> to vector<1x2x32xf32>
    tpu.vector_store %arg5[%38, %c0_21, %c0_22], %41 {strides = array<i32>} : memref<8x2x32xf32, #tpu.memory_space<vmem>>, vector<1x2x32xf32>,
    %c3_i32 = arith.constant 3 : i32
    %42 = arith.index_cast %c3_i32 : i32 to index
    %c0_23 = arith.constant 0 : index
    %c0_24 = arith.constant 0 : index
    %43 = vector.load %arg1[%42, %c0_23, %c0_24] : memref<8x2x4xf32, #tpu.memory_space<vmem>>, vector<1x2x4xf32>
    %44 = vector.shape_cast %43 : vector<1x2x4xf32> to vector<2x4xf32>
    %cst_25 = arith.constant dense<0.000000e+00> : vector<2x32xf32>
    %45 = tpu.matmul %44, %0, %cst_25 {dimension_numbers = #tpu.dot_dimension_numbers<[1], [0], [0], [1], [0, 0, 1, 1], [], []>} : vector<2x4xf32>, vector<4x32xf32>, vector<2x32xf32> -> vector<2x32xf32>
    %46 = arith.addf %45, %4 : vector<2x32xf32>
    %cst_26 = arith.constant dense<0.000000e+00> : vector<2x32xf32>
    %47 = tpu.matmul %37, %1, %cst_26 {dimension_numbers = #tpu.dot_dimension_numbers<[1], [0], [0], [1], [0, 0, 1, 1], [], []>} : vector<2x32xf32>, vector<32x32xf32>, vector<2x32xf32> -> vector<2x32xf32>
    %48 = arith.addf %46, %47 : vector<2x32xf32>
    %49 = math.tanh %48 : vector<2x32xf32>
    %50 = arith.index_cast %c3_i32 : i32 to index
    %c0_27 = arith.constant 0 : index
    %c0_28 = arith.constant 0 : index
    %51 = vector.load %arg5[%50, %c0_27, %c0_28] : memref<8x2x32xf32, #tpu.memory_space<vmem>>, vector<1x2x32xf32>
    %52 = vector.shape_cast %51 : vector<1x2x32xf32> to vector<2x32xf32>
    %53 = vector.shape_cast %49 : vector<2x32xf32> to vector<1x2x32xf32>
    tpu.vector_store %arg5[%50, %c0_27, %c0_28], %53 {strides = array<i32>} : memref<8x2x32xf32, #tpu.memory_space<vmem>>, vector<1x2x32xf32>,
    %c4_i32 = arith.constant 4 : i32
    %54 = arith.index_cast %c4_i32 : i32 to index
    %c0_29 = arith.constant 0 : index
    %c0_30 = arith.constant 0 : index
    %55 = vector.load %arg1[%54, %c0_29, %c0_30] : memref<8x2x4xf32, #tpu.memory_space<vmem>>, vector<1x2x4xf32>
    %56 = vector.shape_cast %55 : vector<1x2x4xf32> to vector<2x4xf32>
    %cst_31 = arith.constant dense<0.000000e+00> : vector<2x32xf32>
    %57 = tpu.matmul %56, %0, %cst_31 {dimension_numbers = #tpu.dot_dimension_numbers<[1], [0], [0], [1], [0, 0, 1, 1], [], []>} : vector<2x4xf32>, vector<4x32xf32>, vector<2x32xf32> -> vector<2x32xf32>
    %58 = arith.addf %57, %4 : vector<2x32xf32>
    %cst_32 = arith.constant dense<0.000000e+00> : vector<2x32xf32>
    %59 = tpu.matmul %49, %1, %cst_32 {dimension_numbers = #tpu.dot_dimension_numbers<[1], [0], [0], [1], [0, 0, 1, 1], [], []>} : vector<2x32xf32>, vector<32x32xf32>, vector<2x32xf32> -> vector<2x32xf32>
    %60 = arith.addf %58, %59 : vector<2x32xf32>
    %61 = math.tanh %60 : vector<2x32xf32>
    %62 = arith.index_cast %c4_i32 : i32 to index
    %c0_33 = arith.constant 0 : index
    %c0_34 = arith.constant 0 : index
    %63 = vector.load %arg5[%62, %c0_33, %c0_34] : memref<8x2x32xf32, #tpu.memory_space<vmem>>, vector<1x2x32xf32>
    %64 = vector.shape_cast %63 : vector<1x2x32xf32> to vector<2x32xf32>
    %65 = vector.shape_cast %61 : vector<2x32xf32> to vector<1x2x32xf32>
    tpu.vector_store %arg5[%62, %c0_33, %c0_34], %65 {strides = array<i32>} : memref<8x2x32xf32, #tpu.memory_space<vmem>>, vector<1x2x32xf32>,
    %c5_i32 = arith.constant 5 : i32
    %66 = arith.index_cast %c5_i32 : i32 to index
    %c0_35 = arith.constant 0 : index
    %c0_36 = arith.constant 0 : index
    %67 = vector.load %arg1[%66, %c0_35, %c0_36] : memref<8x2x4xf32, #tpu.memory_space<vmem>>, vector<1x2x4xf32>
    %68 = vector.shape_cast %67 : vector<1x2x4xf32> to vector<2x4xf32>
    %cst_37 = arith.constant dense<0.000000e+00> : vector<2x32xf32>
    %69 = tpu.matmul %68, %0, %cst_37 {dimension_numbers = #tpu.dot_dimension_numbers<[1], [0], [0], [1], [0, 0, 1, 1], [], []>} : vector<2x4xf32>, vector<4x32xf32>, vector<2x32xf32> -> vector<2x32xf32>
    %70 = arith.addf %69, %4 : vector<2x32xf32>
    %cst_38 = arith.constant dense<0.000000e+00> : vector<2x32xf32>
    %71 = tpu.matmul %61, %1, %cst_38 {dimension_numbers = #tpu.dot_dimension_numbers<[1], [0], [0], [1], [0, 0, 1, 1], [], []>} : vector<2x32xf32>, vector<32x32xf32>, vector<2x32xf32> -> vector<2x32xf32>
    %72 = arith.addf %70, %71 : vector<2x32xf32>
    %73 = math.tanh %72 : vector<2x32xf32>
    %74 = arith.index_cast %c5_i32 : i32 to index
    %c0_39 = arith.constant 0 : index
    %c0_40 = arith.constant 0 : index
    %75 = vector.load %arg5[%74, %c0_39, %c0_40] : memref<8x2x32xf32, #tpu.memory_space<vmem>>, vector<1x2x32xf32>
    %76 = vector.shape_cast %75 : vector<1x2x32xf32> to vector<2x32xf32>
    %77 = vector.shape_cast %73 : vector<2x32xf32> to vector<1x2x32xf32>
    tpu.vector_store %arg5[%74, %c0_39, %c0_40], %77 {strides = array<i32>} : memref<8x2x32xf32, #tpu.memory_space<vmem>>, vector<1x2x32xf32>,
    %c6_i32 = arith.constant 6 : i32
    %78 = arith.index_cast %c6_i32 : i32 to index
    %c0_41 = arith.constant 0 : index
    %c0_42 = arith.constant 0 : index
    %79 = vector.load %arg1[%78, %c0_41, %c0_42] : memref<8x2x4xf32, #tpu.memory_space<vmem>>, vector<1x2x4xf32>
    %80 = vector.shape_cast %79 : vector<1x2x4xf32> to vector<2x4xf32>
    %cst_43 = arith.constant dense<0.000000e+00> : vector<2x32xf32>
    %81 = tpu.matmul %80, %0, %cst_43 {dimension_numbers = #tpu.dot_dimension_numbers<[1], [0], [0], [1], [0, 0, 1, 1], [], []>} : vector<2x4xf32>, vector<4x32xf32>, vector<2x32xf32> -> vector<2x32xf32>
    %82 = arith.addf %81, %4 : vector<2x32xf32>
    %cst_44 = arith.constant dense<0.000000e+00> : vector<2x32xf32>
    %83 = tpu.matmul %73, %1, %cst_44 {dimension_numbers = #tpu.dot_dimension_numbers<[1], [0], [0], [1], [0, 0, 1, 1], [], []>} : vector<2x32xf32>, vector<32x32xf32>, vector<2x32xf32> -> vector<2x32xf32>
    %84 = arith.addf %82, %83 : vector<2x32xf32>
    %85 = math.tanh %84 : vector<2x32xf32>
    %86 = arith.index_cast %c6_i32 : i32 to index
    %c0_45 = arith.constant 0 : index
    %c0_46 = arith.constant 0 : index
    %87 = vector.load %arg5[%86, %c0_45, %c0_46] : memref<8x2x32xf32, #tpu.memory_space<vmem>>, vector<1x2x32xf32>
    %88 = vector.shape_cast %87 : vector<1x2x32xf32> to vector<2x32xf32>
    %89 = vector.shape_cast %85 : vector<2x32xf32> to vector<1x2x32xf32>
    tpu.vector_store %arg5[%86, %c0_45, %c0_46], %89 {strides = array<i32>} : memref<8x2x32xf32, #tpu.memory_space<vmem>>, vector<1x2x32xf32>,
    %c7_i32 = arith.constant 7 : i32
    %90 = arith.index_cast %c7_i32 : i32 to index
    %c0_47 = arith.constant 0 : index
    %c0_48 = arith.constant 0 : index
    %91 = vector.load %arg1[%90, %c0_47, %c0_48] : memref<8x2x4xf32, #tpu.memory_space<vmem>>, vector<1x2x4xf32>
    %92 = vector.shape_cast %91 : vector<1x2x4xf32> to vector<2x4xf32>
    %cst_49 = arith.constant dense<0.000000e+00> : vector<2x32xf32>
    %93 = tpu.matmul %92, %0, %cst_49 {dimension_numbers = #tpu.dot_dimension_numbers<[1], [0], [0], [1], [0, 0, 1, 1], [], []>} : vector<2x4xf32>, vector<4x32xf32>, vector<2x32xf32> -> vector<2x32xf32>
    %94 = arith.addf %93, %4 : vector<2x32xf32>
    %cst_50 = arith.constant dense<0.000000e+00> : vector<2x32xf32>
    %95 = tpu.matmul %85, %1, %cst_50 {dimension_numbers = #tpu.dot_dimension_numbers<[1], [0], [0], [1], [0, 0, 1, 1], [], []>} : vector<2x32xf32>, vector<32x32xf32>, vector<2x32xf32> -> vector<2x32xf32>
    %96 = arith.addf %94, %95 : vector<2x32xf32>
    %97 = math.tanh %96 : vector<2x32xf32>
    %98 = arith.index_cast %c7_i32 : i32 to index
    %c0_51 = arith.constant 0 : index
    %c0_52 = arith.constant 0 : index
    %99 = vector.load %arg5[%98, %c0_51, %c0_52] : memref<8x2x32xf32, #tpu.memory_space<vmem>>, vector<1x2x32xf32>
    %100 = vector.shape_cast %99 : vector<1x2x32xf32> to vector<2x32xf32>
    %101 = vector.shape_cast %97 : vector<2x32xf32> to vector<1x2x32xf32>
    tpu.vector_store %arg5[%98, %c0_51, %c0_52], %101 {strides = array<i32>} : memref<8x2x32xf32, #tpu.memory_space<vmem>>, vector<1x2x32xf32>,
    %c8_i32 = arith.constant 8 : i32
    return
  }
  func.func @transform_0(%arg0: i32) -> (i32, i32, i32) {
    %c0_i32 = arith.constant 0 : i32
    %c0_i32_0 = arith.constant 0 : i32
    %c0_i32_1 = arith.constant 0 : i32
    %c0_i32_2 = arith.constant 0 : i32
    return %c0_i32, %c0_i32_0, %c0_i32_1 : i32, i32, i32
  }
  func.func @transform_1(%arg0: i32) -> (i32, i32) {
    %c0_i32 = arith.constant 0 : i32
    %c0_i32_0 = arith.constant 0 : i32
    %c0_i32_1 = arith.constant 0 : i32
    return %c0_i32, %c0_i32_0 : i32, i32
  }
  func.func @transform_2(%arg0: i32) -> (i32, i32) {
    %c0_i32 = arith.constant 0 : i32
    %c0_i32_0 = arith.constant 0 : i32
    %c0_i32_1 = arith.constant 0 : i32
    return %c0_i32, %c0_i32_0 : i32, i32
  }
  func.func @transform_3(%arg0: i32) -> (i32, i32) {
    %c0_i32 = arith.constant 0 : i32
    %c0_i32_0 = arith.constant 0 : i32
    %c0_i32_1 = arith.constant 0 : i32
    return %c0_i32, %c0_i32_0 : i32, i32
  }
  func.func @transform_4(%arg0: i32) -> (i32, i32, i32) {
    %c0_i32 = arith.constant 0 : i32
    %c0_i32_0 = arith.constant 0 : i32
    %c0_i32_1 = arith.constant 0 : i32
    %c0_i32_2 = arith.constant 0 : i32
    return %c0_i32, %c0_i32_0, %c0_i32_1 : i32, i32, i32
  }
}

</mosaic_0001>

<bundles_post_ra>
// kernel: nas_rnn_forward.1
= control target key start
LH: loop header
LB: loop body
LE: loop exit
PB: predicated region body
PF: predicated region fallthrough
CT: control target
= control target key end

     0   :  { %vm34_vm0 = vcmask 1043456   ;;  %vm30_vm1 = vcmask 31744   ;;  %v1567_v0 = vmov 0.0   ;;  %vm1568_vm2 = vmmov 0   ;;  %s1789_s1 = inlined_call_operand.vmem [shape: f32[4,32], index: 1, kind: input, shape index: {}]   ;;  %s1790_s0 = inlined_call_operand.vmem [shape: f32[8,2,4], index: 0, kind: input, shape index: {}]   ;;  %s1791_s2 = inlined_call_operand.vmem [shape: f32[32,32], index: 2, kind: input, shape index: {}]   ;;  %s1792_s3 = inlined_call_operand.vmem [shape: f32[1,32], index: 3, kind: input, shape index: {}]   ;;  %s1793_s4 = inlined_call_operand.vmem [shape: f32[8,2,32], index: 4, kind: output, shape index: {}]  }
   0x1   :  { %1348 = vmatprep.subr.mxu0 %v1567_v0  ;;  %v1599_v1 = vld [vmem:[%s1789_s1] sm:$0xf]  ;;  %1350 = vmatprep.mubr.msk.f32.mxu0 %vm1568_vm2, %v1567_v0  ;;  %v19_v4 = vld [vmem:[%s1791_s2 + $0x8] sm:$0xff]  ;;  %v20_v5 = vld [vmem:[%s1791_s2 + $0x10] sm:$0xff]  ;;  %v1569_v7 = vmov 0.0|0.0   ;;  %vm184_vm3 = vcmask 254976  }
   0x2   :  { %v29_v2 = vld [vmem:[%s1790_s0] sm:$0x3]  ;;  %1349 = vmatpush3.msk.msra.mxu0 %vm34_vm0, %v1599_v1  ;;  %v21_v6 = vld [vmem:[%s1791_s2 + $0x18] sm:$0xff]  ;;  %1364 = vmatprep.subr.mxu1 %v1567_v0  ;;  %v1257_v10 = vld [vmem:[%s1790_s0 + $0x2] sm:$0x3]  ;;  %vm108_vm4 = vcmask 261120  }
   0x3   :  { %v18_v3 = vld [vmem:[%s1791_s2] sm:$0xff]  ;;  %1351 = vmatmul.mubr.msk.f32.vlgmr.msra.gmra.mrb[0].mxu0 %vm30_vm1, %v29_v2  ;;  %1476 = vmatprep.subr.bf16.mxu0 %v1569_v7  ;;  %v1630_v9 = vpack.c.bf16 %v21_v6, %v20_v5  ;;  %v1272_v26 = vld [vmem:[%s1790_s0 + $0x8] sm:$0x3]  ;;  %v1277_v31 = vld [vmem:[%s1790_s0 + $0xa] sm:$0x3] }
   0x4   :  { %v1623_v8 = vpack.c.bf16 %v19_v4, %v18_v3  ;;  %1361 = vmatprep.mubr.msk.f32.mxu0 %vm1568_vm2, %v1567_v0  ;;  %1365 = vmatpush3.msk.msra.mxu1 %vm34_vm0, %v1599_v1  ;;  %v1657_v11 = vld [vmem:[%s1792_s3] ss:$0 sm:$0xff]  ;;  %v1262_v16 = vld [vmem:[%s1790_s0 + $0x4] sm:$0x3]  ;;  %v1267_v21 = vld [vmem:[%s1790_s0 + $0x6] sm:$0x3] }
   0x5   :  { %1366 = vmatprep.mubr.msk.f32.mxu1 %vm1568_vm2, %v1567_v0  ;;  %1482 = vmatprep.subr.bf16.mxu1 %v1569_v7  ;;  %v1282_v36 = vld [vmem:[%s1790_s0 + $0xc] sm:$0x3]  ;;  %v1287_v41 = vld [vmem:[%s1790_s0 + $0xe] sm:$0x3] }
   0x6   :  { %1478 = vmatpush3.bf16.msra.mxu0 %v1623_v8  ;;  %1367 = vmatmul.mubr.msk.f32.vlgmr.msra.gmra.mrb[0].mxu1 %vm30_vm1, %v1257_v10 }
   0x7   :  { %1479 = vmatprep.subr.bf16.mxu0 %v1569_v7  ;;  %1484 = vmatpush3.bf16.msra.mxu1 %v1623_v8 }
   0x8   :  { %1377 = vmatprep.mubr.msk.f32.mxu1 %vm1568_vm2, %v1567_v0  ;;  %1485 = vmatprep.subr.bf16.mxu1 %v1569_v7 }
   0xa   :  { %1481 = vmatpush3.bf16.msra.mxu0 %v1630_v9 }
   0xb   :  { %1380 = vmatprep.subr.mxu0 %v1567_v0  ;;  %1487 = vmatpush3.bf16.msra.mxu1 %v1630_v9 }
   0xc   :  { %1396 = vmatprep.subr.mxu1 %v1567_v0 }
   0xd   :  { %1362 = vmatmul.mubr.f32.vlgmr.msra.gmra.mrb[0].mxu0 %v1567_v0 }
   0xe   :  { %1381 = vmatpush3.msk.msra.mxu0 %vm34_vm0, %v1599_v1  ;;  %1382 = vmatprep.mubr.msk.f32.mxu0 %vm1568_vm2, %v1567_v0 }
   0xf   :  { %1488 = vmatprep.subr.bf16.mxu0 %v1569_v7 }
  0x11   :  { %1383 = vmatmul.mubr.msk.f32.vlgmr.msra.gmra.mrb[2].mxu0 %vm30_vm1, %v1262_v16 }
  0x12   :  { %1490 = vmatpush3.bf16.msra.mxu0 %v1623_v8  ;;  %1393 = vmatprep.mubr.msk.f32.mxu0 %vm1568_vm2, %v1567_v0 }
  0x13   :  { %1491 = vmatprep.subr.bf16.mxu0 %v1569_v7 }
  0x16   :  { %1493 = vmatpush3.bf16.msra.mxu0 %v1630_v9 }
  0x17   :  { %1412 = vmatprep.subr.mxu0 %v1567_v0 }
  0xe0   :  { %v178_v12 = vpop.f32.mrb[0].mxu0 }
  0xe1   :  { %v1524_v13 = vadd.f32 %v1657_v11, %v178_v12  ;;  %v1363_v14 = vpop.f32.mrb[1].mxu0 }
  0xe3   :  { %1551 = vtanh.f32 %v1524_v13 }
  0xed   :  { %v1552_v15 = vpop.eup %1551 }
  0xee   :  { %185 = vst.msk [vmem:[%s1793_s4] sm:$0x3] %vm184_vm3, %v1552_v15  ;;  %1378 = vmatmul.mubr.msk.f32.vlgmr.msra.gmra.mrb[0].mxu1 %vm108_vm4, %v1552_v15 }
  0xef   :  { %1397 = vmatpush3.msk.msra.mxu1 %vm34_vm0, %v1599_v1  ;;  %1398 = vmatprep.mubr.msk.f32.mxu1 %vm1568_vm2, %v1567_v0 }
  0xf0   :  { %1494 = vmatprep.subr.bf16.mxu1 %v1569_v7 }
  0xf2   :  { %1399 = vmatmul.mubr.msk.f32.vlgmr.msra.gmra.mrb[2].mxu1 %vm30_vm1, %v1267_v21 }
  0xf3   :  { %1496 = vmatpush3.bf16.msra.mxu1 %v1623_v8  ;;  %1409 = vmatprep.mubr.msk.f32.mxu1 %vm1568_vm2, %v1567_v0 }
  0xf4   :  { %1497 = vmatprep.subr.bf16.mxu1 %v1569_v7 }
  0xf7   :  { %1499 = vmatpush3.bf16.msra.mxu1 %v1630_v9 }
  0xf8   :  { %1428 = vmatprep.subr.mxu1 %v1567_v0 }
 0x1c1   :  { %v330_v17 = vpop.f32.mrb[0].mxu1 }
 0x1c2   :  { %v1525_v18 = vadd.f32 %v1657_v11, %v330_v17  ;;  %v1379_v19 = vpop.f32.mrb[1].mxu1 }
 0x1c4   :  { %1553 = vtanh.f32 %v1525_v18 }
 0x1ce   :  { %v1554_v20 = vpop.eup %1553 }
 0x1cf   :  { %1261 = vst.msk [vmem:[%s1793_s4 + $0x2] sm:$0x3] %vm184_vm3, %v1554_v20  ;;  %1394 = vmatmul.mubr.msk.f32.vlgmr.msra.gmra.mrb[2].mxu0 %vm108_vm4, %v1554_v20 }
 0x1d0   :  { %1413 = vmatpush3.msk.msra.mxu0 %vm34_vm0, %v1599_v1  ;;  %1414 = vmatprep.mubr.msk.f32.mxu0 %vm1568_vm2, %v1567_v0 }
 0x1d1   :  { %1500 = vmatprep.subr.bf16.mxu0 %v1569_v7 }
 0x1d3   :  { %1415 = vmatmul.mubr.msk.f32.vlgmr.msra.gmra.mrb[4].mxu0 %vm30_vm1, %v1272_v26 }
 0x1d4   :  { %1502 = vmatpush3.bf16.msra.mxu0 %v1623_v8  ;;  %1425 = vmatprep.mubr.msk.f32.mxu0 %vm1568_vm2, %v1567_v0 }
 0x1d5   :  { %1503 = vmatprep.subr.bf16.mxu0 %v1569_v7 }
 0x1d8   :  { %1505 = vmatpush3.bf16.msra.mxu0 %v1630_v9 }
 0x1d9   :  { %1444 = vmatprep.subr.mxu0 %v1567_v0 }
 0x2a2   :  { %v482_v22 = vpop.f32.mrb[2].mxu0 }
 0x2a3   :  { %v1526_v23 = vadd.f32 %v1657_v11, %v482_v22  ;;  %v1395_v24 = vpop.f32.mrb[3].mxu0 }
 0x2a5   :  { %1555 = vtanh.f32 %v1526_v23 }
 0x2af   :  { %v1556_v25 = vpop.eup %1555 }
 0x2b0   :  { %1266 = vst.msk [vmem:[%s1793_s4 + $0x4] sm:$0x3] %vm184_vm3, %v1556_v25  ;;  %1410 = vmatmul.mubr.msk.f32.vlgmr.msra.gmra.mrb[2].mxu1 %vm108_vm4, %v1556_v25 }
 0x2b1   :  { %1429 = vmatpush3.msk.msra.mxu1 %vm34_vm0, %v1599_v1  ;;  %1430 = vmatprep.mubr.msk.f32.mxu1 %vm1568_vm2, %v1567_v0 }
 0x2b2   :  { %1506 = vmatprep.subr.bf16.mxu1 %v1569_v7 }
 0x2b4   :  { %1431 = vmatmul.mubr.msk.f32.vlgmr.msra.gmra.mrb[4].mxu1 %vm30_vm1, %v1277_v31 }
 0x2b5   :  { %1508 = vmatpush3.bf16.msra.mxu1 %v1623_v8  ;;  %1441 = vmatprep.mubr.msk.f32.mxu1 %vm1568_vm2, %v1567_v0 }
 0x2b6   :  { %1509 = vmatprep.subr.bf16.mxu1 %v1569_v7 }
 0x2b9   :  { %1511 = vmatpush3.bf16.msra.mxu1 %v1630_v9 }
 0x2ba   :  { %1460 = vmatprep.subr.mxu1 %v1567_v0 }
 0x383   :  { %v634_v27 = vpop.f32.mrb[2].mxu1 }
 0x384   :  { %v1527_v28 = vadd.f32 %v1657_v11, %v634_v27  ;;  %v1411_v29 = vpop.f32.mrb[3].mxu1 }
 0x386   :  { %1557 = vtanh.f32 %v1527_v28 }
 0x390   :  { %v1558_v30 = vpop.eup %1557 }
 0x391   :  { %1271 = vst.msk [vmem:[%s1793_s4 + $0x6] sm:$0x3] %vm184_vm3, %v1558_v30  ;;  %1426 = vmatmul.mubr.msk.f32.vlgmr.msra.gmra.mrb[4].mxu0 %vm108_vm4, %v1558_v30 }
 0x392   :  { %1445 = vmatpush3.msk.msra.mxu0 %vm34_vm0, %v1599_v1  ;;  %1446 = vmatprep.mubr.msk.f32.mxu0 %vm1568_vm2, %v1567_v0 }
 0x393   :  { %1512 = vmatprep.subr.bf16.mxu0 %v1569_v7 }
 0x395   :  { %1447 = vmatmul.mubr.msk.f32.vlgmr.msra.gmra.mrb[6].mxu0 %vm30_vm1, %v1282_v36 }
 0x396   :  { %1514 = vmatpush3.bf16.msra.mxu0 %v1623_v8  ;;  %1457 = vmatprep.mubr.msk.f32.mxu0 %vm1568_vm2, %v1567_v0 }
 0x397   :  { %1515 = vmatprep.subr.bf16.mxu0 %v1569_v7 }
 0x39a   :  { %1517 = vmatpush3.bf16.msra.mxu0 %v1630_v9 }
 0x464   :  { %v786_v32 = vpop.f32.mrb[4].mxu0 }
 0x465   :  { %v1528_v33 = vadd.f32 %v1657_v11, %v786_v32  ;;  %v1427_v34 = vpop.f32.mrb[5].mxu0 }
 0x467   :  { %1559 = vtanh.f32 %v1528_v33 }
 0x471   :  { %v1560_v35 = vpop.eup %1559 }
 0x472   :  { %1276 = vst.msk [vmem:[%s1793_s4 + $0x8] sm:$0x3] %vm184_vm3, %v1560_v35  ;;  %1442 = vmatmul.mubr.msk.f32.vlgmr.msra.gmra.mrb[4].mxu1 %vm108_vm4, %v1560_v35 }
 0x473   :  { %1461 = vmatpush3.msk.msra.mxu1 %vm34_vm0, %v1599_v1  ;;  %1462 = vmatprep.mubr.msk.f32.mxu1 %vm1568_vm2, %v1567_v0 }
 0x474   :  { %1518 = vmatprep.subr.bf16.mxu1 %v1569_v7 }
 0x476   :  { %1463 = vmatmul.mubr.msk.f32.vlgmr.msra.gmra.mrb[6].mxu1 %vm30_vm1, %v1287_v41 }
 0x477   :  { %1520 = vmatpush3.bf16.msra.mxu1 %v1623_v8  ;;  %1473 = vmatprep.mubr.msk.f32.mxu1 %vm1568_vm2, %v1567_v0 }
 0x478   :  { %1521 = vmatprep.subr.bf16.mxu1 %v1569_v7 }
 0x47b   :  { %1523 = vmatpush3.bf16.msra.mxu1 %v1630_v9 }
 0x545   :  { %v938_v37 = vpop.f32.mrb[4].mxu1 }
 0x546   :  { %v1529_v38 = vadd.f32 %v1657_v11, %v938_v37  ;;  %v1443_v39 = vpop.f32.mrb[5].mxu1 }
 0x548   :  { %1561 = vtanh.f32 %v1529_v38 }
 0x552   :  { %v1562_v40 = vpop.eup %1561 }
 0x553   :  { %1281 = vst.msk [vmem:[%s1793_s4 + $0xa] sm:$0x3] %vm184_vm3, %v1562_v40  ;;  %1458 = vmatmul.mubr.msk.f32.vlgmr.msra.gmra.mrb[6].mxu0 %vm108_vm4, %v1562_v40 }
 0x626   :  { %v1090_v42 = vpop.f32.mrb[6].mxu0 }
 0x627   :  { %v1530_v43 = vadd.f32 %v1657_v11, %v1090_v42  ;;  %v1459_v44 = vpop.f32.mrb[7].mxu0 }
 0x629   :  { %1563 = vtanh.f32 %v1530_v43 }
 0x633   :  { %v1564_v45 = vpop.eup %1563 }
 0x634   :  { %1286 = vst.msk [vmem:[%s1793_s4 + $0xc] sm:$0x3] %vm184_vm3, %v1564_v45  ;;  %1474 = vmatmul.mubr.msk.f32.vlgmr.msra.gmra.mrb[6].mxu1 %vm108_vm4, %v1564_v45 }
 0x707   :  { %v1242_v46 = vpop.f32.mrb[6].mxu1 }
 0x708   :  { %v1531_v47 = vadd.f32 %v1657_v11, %v1242_v46  ;;  %v1475_v48 = vpop.f32.mrb[7].mxu1 }
 0x70a   :  { %1565 = vtanh.f32 %v1531_v47 }
 0x714   :  { %v1566_v49 = vpop.eup %1565 }
 0x715   :  { %1291 = vst.msk [vmem:[%s1793_s4 + $0xe] sm:$0x3] %vm184_vm3, %v1566_v49 }

</bundles_post_ra>
